<compile_context>
chip_gen: v6e
topology: v6e:2x2x1
jax: 0.10.0
libtpu: 0.0.40
codegen_flags: <defaults>
</compile_context>

<pallas_src>
import functools

import jax
import jax.numpy as jnp
from jax.experimental import pallas as pl
from jax.experimental.pallas import tpu as pltpu


COMPUTE_DTYPE = jnp.float32   # set to jnp.bfloat16 on v6e/v7x for half HBM bytes
MAX_TILE_B = 32768            # x tile ~0.5 MiB, h1 ~4 MiB f32: tiny vs any VMEM


def _mlp_kernel(p_ref, x_ref, o_ref):
    """Feature-major fused MLP.

    p_ref: (6, 32, 32) packed params (constant index_map -> VMEM-resident).
    x_ref: (4, TILE_B)  inputs, batch on the 128-wide lane axis.
    o_ref: (3, TILE_B)  logits, lane-dense store.
    """
    x = x_ref[...]                                           # (4, TB)

    w1 = p_ref[0, :, 0:4]                                    # (32, 4)
    b1 = p_ref[1, :, 0:1].astype(jnp.float32)                # (32, 1)
    w2 = p_ref[2, 0:16, :]                                   # (16, 32)
    b2 = p_ref[3, 0:16, 0:1].astype(jnp.float32)             # (16, 1)
    w3 = p_ref[4, 0:3, 0:16]                                 # (3, 16)
    b3 = p_ref[5, 0:3, 0:1].astype(jnp.float32)              # (3, 1)

    # ---- Layer 1 on the MXU (K=4 only pads to sublane granularity in VMEM).
    h1 = jnp.dot(w1, x.astype(w1.dtype), preferred_element_type=jnp.float32)
    h1 = jnp.maximum(h1 + b1, 0.0)                           # (32, TB) ReLU

    # Dropout(p=0.01): identity at inference time.

    # ---- Layers 2/3 on the MXU, f32 accumulation.
    h2 = jnp.dot(w2, h1.astype(w2.dtype), preferred_element_type=jnp.float32)
    h2 = jnp.maximum(h2 + b2, 0.0)                           # (16, TB) ReLU

    out = jnp.dot(w3, h2.astype(w3.dtype), preferred_element_type=jnp.float32)
    o_ref[...] = (out + b3).astype(o_ref.dtype)              # (3, TB)


def pack_params(params, dtype=None):
    """Pack all weights/biases (PyTorch (out, in) layout) into one buffer.

    Call ONCE at model load; pass the packed slab to the forward.
    Slabs (zero padded):
      [0] W1 (32,4)   [1] b1 (32,1)   [2] W2 (16,32)
      [3] b2 (16,1)   [4] W3 (3,16)   [5] b3 (3,1)
    """
    if dtype is None:                      # bind at call time, not def time
        dtype = COMPUTE_DTYPE
    p = jnp.zeros((6, 32, 32), dtype)
    p = p.at[0, :32, :4].set(params["w1"].astype(dtype))
    p = p.at[1, :32, 0].set(params["b1"].astype(dtype))
    p = p.at[2, :16, :32].set(params["w2"].astype(dtype))
    p = p.at[3, :16, 0].set(params["b2"].astype(dtype))
    p = p.at[4, :3, :16].set(params["w3"].astype(dtype))
    p = p.at[5, :3, 0].set(params["b3"].astype(dtype))
    return p


def _choose_tiling(batch):
    """Pick (tile_b, b_pad): big tiles to amortize grid-step overhead, but keep
    >= 2 tiles when there is enough work so v7x can shard over both TCs."""
    b128 = int(pl.cdiv(batch, 128)) * 128
    tile_b = min(MAX_TILE_B, b128)
    if tile_b == b128 and b128 >= 256:
        tile_b = int(pl.cdiv(b128 // 2, 128)) * 128
    b_pad = int(pl.cdiv(b128, tile_b)) * tile_b
    return tile_b, b_pad


def _forward_fm(x_fm, packed):
    """Core path: x_fm is feature-major (4, B); returns logits (3, B)."""
    B = x_fm.shape[1]
    tile_b, b_pad = _choose_tiling(B)
    if b_pad != B:
        x_fm = jnp.pad(x_fm, ((0, 0), (0, b_pad - B)))       # tail-only pad

    out_fm = pl.pallas_call(
        _mlp_kernel,
        out_shape=jax.ShapeDtypeStruct((3, b_pad), packed.dtype),
        grid=(b_pad // tile_b,),
        in_specs=[
            # One DMA for all params; constant index -> stays VMEM-resident.
            pl.BlockSpec((6, 32, 32), lambda i: (0, 0, 0)),
            # x streamed one batch tile per grid step (double-buffered).
            # TODO(synk): on v5e, if the x DMA shows up exposed in the trace,
            # add pipeline_mode=pl.Buffered(3) here.
            pl.BlockSpec((4, tile_b), lambda i: (0, i)),
        ],
        out_specs=pl.BlockSpec((3, tile_b), lambda i: (0, i)),
        compiler_params=pltpu.CompilerParams(
            # batch tiles are independent -> v7x shards them over both TCs.
            dimension_semantics=("parallel",)),
    )(packed, x_fm)

    return out_fm[:, :B]


@jax.jit
def iris_classifier_forward(x, packed):
    """Convenience wrapper: x is [B, 4] (PyTorch layout), returns [B, 3].

    The transpose/pad/slice all live under this jit and fuse with the kernel's
    in/out streams; callers that already keep data feature-major should use
    _forward_fm directly and skip both transposes.
    """
    x_fm = x.T.astype(packed.dtype)                          # (4, B)
    return _forward_fm(x_fm, packed).T                       # (B, 3)


def init_params(key):
    """Deterministic init mimicking nn.Linear (PyTorch (out, in) layout)."""
    ks = jax.random.split(key, 6)

    def linear(kw, kb, fan_in, fan_out):
        bound = 1.0 / jnp.sqrt(fan_in)
        w = jax.random.uniform(kw, (fan_out, fan_in), jnp.float32, -bound, bound)
        b = jax.random.uniform(kb, (fan_out,), jnp.float32, -bound, bound)
        return w, b

    w1, b1 = linear(ks[0], ks[1], 4, 32)
    w2, b2 = linear(ks[2], ks[3], 32, 16)
    w3, b3 = linear(ks[4], ks[5], 16, 3)
    return {"w1": w1, "b1": b1, "w2": w2, "b2": b2, "w3": w3, "b3": b3}


def _reference_forward(x, p):
    h1 = jnp.maximum(x @ p["w1"].T + p["b1"], 0.0)
    h2 = jnp.maximum(h1 @ p["w2"].T + p["b2"], 0.0)
    return h2 @ p["w3"].T + p["b3"]


if __name__ == "__main__":
    key = jax.random.PRNGKey(0)
    k_param, k_x = jax.random.split(key)

    params = init_params(k_param)
    x = jax.random.normal(k_x, (8, 4), dtype=jnp.float32)    # batch=8, features=4

    packed = pack_params(params)                             # pack once at load
    out = iris_classifier_forward(x, packed)
    out = jax.block_until_ready(out)

    ref = _reference_forward(x, params)
    tol = 1e-4 if COMPUTE_DTYPE == jnp.float32 else 2e-2
    assert out.shape == (8, 3)
    assert jnp.allclose(out.astype(jnp.float32), ref, atol=tol, rtol=tol)

    print("KERNEL_OK")
</pallas_src>

<mosaic_0001>
module attributes {stable_mosaic.version = 11 : i64} {
  func.func @_mlp_kernel(%arg0: i32, %arg1: memref<6x32x32xf32, #tpu.memory_space<vmem>>, %arg2: memref<4x128xf32, #tpu.memory_space<vmem>>, %arg3: memref<3x128xf32, #tpu.memory_space<vmem>>) attributes {dimension_semantics = [#tpu.dimension_semantics<parallel>], iteration_bounds = array<i64: 1>, scalar_prefetch = 0 : i64, scratch_operands = 0 : i64, tpu.core_type = #tpu.core_type<tc>, window_params = [{pipeline_mode = #tpu.pipeline_mode<synchronous>, transform_indices = @transform_0, window_bounds = array<i64: 6, 32, 32>}, {transform_indices = @transform_1, window_bounds = array<i64: 4, 128>}, {transform_indices = @transform_2, window_bounds = array<i64: 3, 128>}]} {
    %c0 = arith.constant 0 : index
    %c0_0 = arith.constant 0 : index
    %0 = vector.load %arg2[%c0, %c0_0] : memref<4x128xf32, #tpu.memory_space<vmem>>, vector<4x128xf32>
    %c0_1 = arith.constant 0 : index
    %c0_2 = arith.constant 0 : index
    %c0_3 = arith.constant 0 : index
    %1 = vector.load %arg1[%c0_1, %c0_2, %c0_3] : memref<6x32x32xf32, #tpu.memory_space<vmem>>, vector<1x32x4xf32>
    %2 = vector.shape_cast %1 : vector<1x32x4xf32> to vector<32x4xf32>
    %c1 = arith.constant 1 : index
    %c0_4 = arith.constant 0 : index
    %c0_5 = arith.constant 0 : index
    %3 = vector.load %arg1[%c1, %c0_4, %c0_5] : memref<6x32x32xf32, #tpu.memory_space<vmem>>, vector<1x32x1xf32>
    %4 = vector.shape_cast %3 : vector<1x32x1xf32> to vector<32x1xf32>
    %c2 = arith.constant 2 : index
    %c0_6 = arith.constant 0 : index
    %c0_7 = arith.constant 0 : index
    %5 = vector.load %arg1[%c2, %c0_6, %c0_7] : memref<6x32x32xf32, #tpu.memory_space<vmem>>, vector<1x16x32xf32>
    %6 = vector.shape_cast %5 : vector<1x16x32xf32> to vector<16x32xf32>
    %c3 = arith.constant 3 : index
    %c0_8 = arith.constant 0 : index
    %c0_9 = arith.constant 0 : index
    %7 = vector.load %arg1[%c3, %c0_8, %c0_9] : memref<6x32x32xf32, #tpu.memory_space<vmem>>, vector<1x16x1xf32>
    %8 = vector.shape_cast %7 : vector<1x16x1xf32> to vector<16x1xf32>
    %c4 = arith.constant 4 : index
    %c0_10 = arith.constant 0 : index
    %c0_11 = arith.constant 0 : index
    %9 = vector.load %arg1[%c4, %c0_10, %c0_11] : memref<6x32x32xf32, #tpu.memory_space<vmem>>, vector<1x3x16xf32>
    %10 = vector.shape_cast %9 : vector<1x3x16xf32> to vector<3x16xf32>
    %c5 = arith.constant 5 : index
    %c0_12 = arith.constant 0 : index
    %c0_13 = arith.constant 0 : index
    %11 = vector.load %arg1[%c5, %c0_12, %c0_13] : memref<6x32x32xf32, #tpu.memory_space<vmem>>, vector<1x3x1xf32>
    %12 = vector.shape_cast %11 : vector<1x3x1xf32> to vector<3x1xf32>
    %cst = arith.constant dense<0.000000e+00> : vector<32x128xf32>
    %13 = tpu.matmul %2, %0, %cst {dimension_numbers = #tpu.dot_dimension_numbers<[1], [0], [0], [1], [0, 0, 1, 1], [], []>} : vector<32x4xf32>, vector<4x128xf32>, vector<32x128xf32> -> vector<32x128xf32>
    %14 = vector.broadcast %4 : vector<32x1xf32> to vector<32x128xf32>
    %15 = arith.addf %13, %14 : vector<32x128xf32>
    %cst_14 = arith.constant 0.000000e+00 : f32
    %16 = vector.broadcast %cst_14 : f32 to vector<32x128xf32>
    %17 = arith.maximumf %15, %16 : vector<32x128xf32>
    %cst_15 = arith.constant dense<0.000000e+00> : vector<16x128xf32>
    %18 = tpu.matmul %6, %17, %cst_15 {dimension_numbers = #tpu.dot_dimension_numbers<[1], [0], [0], [1], [0, 0, 1, 1], [], []>} : vector<16x32xf32>, vector<32x128xf32>, vector<16x128xf32> -> vector<16x128xf32>
    %19 = vector.broadcast %8 : vector<16x1xf32> to vector<16x128xf32>
    %20 = arith.addf %18, %19 : vector<16x128xf32>
    %cst_16 = arith.constant 0.000000e+00 : f32
    %21 = vector.broadcast %cst_16 : f32 to vector<16x128xf32>
    %22 = arith.maximumf %20, %21 : vector<16x128xf32>
    %cst_17 = arith.constant dense<0.000000e+00> : vector<3x128xf32>
    %23 = tpu.matmul %10, %22, %cst_17 {dimension_numbers = #tpu.dot_dimension_numbers<[1], [0], [0], [1], [0, 0, 1, 1], [], []>} : vector<3x16xf32>, vector<16x128xf32>, vector<3x128xf32> -> vector<3x128xf32>
    %24 = vector.broadcast %12 : vector<3x1xf32> to vector<3x128xf32>
    %25 = arith.addf %23, %24 : vector<3x128xf32>
    %c0_18 = arith.constant 0 : index
    %c0_19 = arith.constant 0 : index
    %26 = vector.load %arg3[%c0_18, %c0_19] : memref<3x128xf32, #tpu.memory_space<vmem>>, vector<3x128xf32>
    tpu.vector_store %arg3[%c0_18, %c0_19], %25 {strides = array<i32>} : memref<3x128xf32, #tpu.memory_space<vmem>>, vector<3x128xf32>,
    return
  }
  func.func @transform_0(%arg0: i32) -> (i32, i32, i32) {
    %c0_i32 = arith.constant 0 : i32
    %c0_i32_0 = arith.constant 0 : i32
    %c0_i32_1 = arith.constant 0 : i32
    %c0_i32_2 = arith.constant 0 : i32
    return %c0_i32, %c0_i32_0, %c0_i32_1 : i32, i32, i32
  }
  func.func @transform_1(%arg0: i32) -> (i32, i32) {
    %c0_i32 = arith.constant 0 : i32
    %c0_i32_0 = arith.constant 0 : i32
    return %c0_i32, %arg0 : i32, i32
  }
  func.func @transform_2(%arg0: i32) -> (i32, i32) {
    %c0_i32 = arith.constant 0 : i32
    %c0_i32_0 = arith.constant 0 : i32
    return %c0_i32, %arg0 : i32, i32
  }
}

</mosaic_0001>

<bundles_post_ra>
// kernel: iris_classifier_forward.1
= control target key start
LH: loop header
LB: loop body
LE: loop exit
PB: predicated region body
PF: predicated region fallthrough
CT: control target
= control target key end

     0   :  { %7 = vsyncpa [#allocation3], 0  ;;  %s428_s9 = smov [#allocation2]   ;;  %s464_s0 = inlined_call_operand.hbm [shape: f32[6,32,32], index: 0, kind: input, shape index: {}]   ;;  %s465_s1 = inlined_call_operand.vmem [shape: f32[4,128], index: 1, kind: input, shape index: {}]   ;;  %s466_s2 = inlined_call_operand.vmem [shape: f32[3,128], index: 2, kind: output, shape index: {}]  }
   0x1   :  { %s13_s10 = sshll.u32 %s428_s9, 4  ;;  %s14_s10 = int_to_ptr.vmem [resolvable:$true] %s13_s10 }
   0x2   :  { %s414_s11 = scalar_lea.vmem %s14_s10, 3072  ;;  %p419_p1 = scmp.lt.s32.totalorder %s14_s10, %s14_s10 }
   0x3   :  { %p415_p0 = scmp.ne.s32.totalorder %s14_s10, %s414_s11  ;;  %p420_p2 = scmp.lt.s32.totalorder %s414_s11, %s414_s11 }
   0x5   :  { %p421_p3 = por %p420_p2, %p419_p1 }
   0x7   :  { %p422_p4 = pnand %p421_p3, %p415_p0 }
   0x9   :  { %425 = shalt.err (!%p422_p4)
}
   0xa   :  { %s429_s12 = smov 128   ;;  %s430_s13 = smov 8  }
   0xb   :  { %19 = dma.hbm_to_vmem [thread:$0]  %s464_s0, 3072, %s14_s10, [#allocation3], %s429_s12, %s429_s12, %s430_s13  }
   0xc   :  { %426 = dma.done.wait [#allocation3], 3072  }
   0xd   :  { %427 = vsyncadd [#allocation3], 4294964224  ;;  %v431_v0 = vmov 0   ;;  %vm78_vm0 = vcmask 1043456   ;;  %vm65_vm1 = vcmask 31744   ;;  %v26_v2 = vld [vmem:[#allocation2] sm:$0xff] }
   0xe   :  { %404 = vset.pattern.permute.xlu0 %v431_v0  ;;  %405 = vset.pattern.permute.xlu1 %v431_v0  ;;  %v25_v1 = vld [vmem:[%s465_s1] sm:$0xf]  ;;  %v27_v3 = vld [vmem:[#allocation2 + $0x8] sm:$0xff]  ;;  %v28_v4 = vld [vmem:[#allocation2 + $0x10] sm:$0xff]  ;;  %vm181_vm2 = vcmask 261120   ;;  %v432_v31 = vmov 0.0  }
   0xf   :  { %372 = vmatprep.subr.msk.mxu0 %vm78_vm0, %v25_v1  ;;  %374 = vmatprep.mubr.msk.f32.mxu0 %vm65_vm1, %v26_v2  ;;  %v34_v5 = vld [vmem:[#allocation2 + $0x38] sm:$0xff]  ;;  %v32_v6 = vld [vmem:[#allocation2 + $0x28] sm:$0xff]  ;;  %v33_v7 = vld [vmem:[#allocation2 + $0x30] sm:$0xff]  ;;  %vm433_vm3 = vmmov 0   ;;  %vm270_vm4 = vcmask 130048  }
  0x10   :  { %373 = vmatpush3.msk.msra.mxu0 %vm78_vm0, %v25_v1  ;;  %62 = vperm.xlu0 %404, %v34_v5   ;;  %v29_v8 = vld [vmem:[#allocation2 + $0x18] sm:$0xff]  ;;  %v31_v9 = vld [vmem:[#allocation2 + $0x20] sm:$0xff]  ;;  %v40_v10 = vld [vmem:[#allocation2 + $0x68] sm:$0xff] }
  0x11   :  { %375 = vmatmul.mubr.msk.f32.vlgmr.msra.gmra.mxu0 %vm65_vm1, %v27_v3  ;;  %52 = vperm.xlu1 %405, %v32_v6   ;;  %v39_v11 = vld [vmem:[#allocation2 + $0x60] sm:$0xff]  ;;  %v37_v30 = vld [vmem:[#allocation2 + $0x48] sm:$0xff] }
  0x12   :  { %377 = vmatprep.mubr.msk.f32.mxu0 %vm65_vm1, %v28_v4  ;;  %v44_v12 = vld [vmem:[#allocation2 + $0xa0] sm:$0x7]  ;;  %391 = vmatprep.subr.mxu0 %v432_v31 }
  0x13   :  { %v36_v13 = vld [vmem:[#allocation2 + $0x40] sm:$0xff] }
  0x14   :  { %57 = vperm.xlu0 %404, %v33_v7   ;;  %388 = vmatprep.mubr.msk.f32.mxu1 %vm181_vm2, %v36_v13  ;;  %v42_v40 = vld [vmem:[#allocation2 + $0x80] sm:$0x7] }
  0x15   :  { %378 = vmatmul.mubr.msk.f32.gmra.mxu0 %vm65_vm1, %v29_v8  ;;  %47 = vperm.xlu1 %405, %v31_v9  }
  0x16   :  { %395 = vmatprep.mubr.msk.f32.mxu0 %vm433_vm3, %v432_v31 }
  0x18   :  { %178 = vperm.xlu0 %404, %v40_v10  }
  0x19   :  { %173 = vperm.xlu1 %405, %v39_v11  }
  0x1c   :  { %267 = vperm.xlu0 %404, %v44_v12  }
  0x8b   :  { %v63_v14 = vpop.permute.xlu0 %62 }
  0x8c   :  { %v53_v15 = vpop.permute.xlu1 %52 }
  0x8f   :  { %v58_v19 = vpop.permute.xlu0 %57 }
  0x90   :  { %v48_v21 = vpop.permute.xlu1 %47 }
  0x93   :  { %v179_v32 = vpop.permute.xlu0 %178 }
  0x94   :  { %v174_v35 = vpop.permute.xlu1 %173 }
  0x97   :  { %v268_v41 = vpop.permute.xlu0 %267 }
  0xd1   :  { %v376_v16 = vpop.f32.mrf.mxu0 }
  0xd2   :  { %v154_v23 = vadd.f32 %v376_v16, %v53_v15 }
  0xd3   :  { %v148_v17 = vpop.f32.mrf.mxu0 }
  0xd4   :  { %v149_v26 = vadd.f32 %v148_v17, %v48_v21  ;;  %v168_v28 = vmax.f32 %v154_v23, 0.0 }
  0xd5   :  { %v379_v18 = vpop.f32.mrf.mxu0 }
  0xd6   :  { %v164_v20 = vadd.f32 %v379_v18, %v63_v14  ;;  %v167_v29 = vmax.f32 %v149_v26, 0.0 }
  0xd7   :  { %v158_v22 = vpop.f32.mrf.mxu0 }
  0xd8   :  { %v170_v24 = vmax.f32 %v164_v20, 0.0  ;;  %v159_v25 = vadd.f32 %v158_v22, %v58_v19 }
  0xda   :  { %v169_v27 = vmax.f32 %v159_v25, 0.0  ;;  %380 = vmatprep.subr.mxu1 %v170_v24 }
  0xdb   :  { %381 = vmatpush3.msra.mxu1 %v170_v24 }
  0xdc   :  { %382 = vmatprep.subr.mxu1 %v169_v27 }
  0xdd   :  { %383 = vmatpush3.msra.mxu1 %v169_v27 }
  0xde   :  { %384 = vmatprep.subr.mxu1 %v168_v28 }
  0xdf   :  { %385 = vmatpush3.msra.mxu1 %v168_v28 }
  0xe0   :  { %386 = vmatprep.subr.mxu1 %v167_v29 }
  0xe1   :  { %387 = vmatpush3.msra.mxu1 %v167_v29 }
  0xe2   :  { %389 = vmatmul.mubr.msk.f32.vlgmr.msra.gmra.mxu1 %vm181_vm2, %v37_v30 }
 0x1a2   :  { %v390_v33 = vpop.f32.mrf.mxu1 }
 0x1a3   :  { %v260_v34 = vadd.f32 %v390_v33, %v179_v32 }
 0x1a4   :  { %v254_v36 = vpop.f32.mrf.mxu1 }
 0x1a5   :  { %v264_v37 = vmax.f32 %v260_v34, 0.0  ;;  %v255_v38 = vadd.f32 %v254_v36, %v174_v35 }
 0x1a7   :  { %v263_v39 = vmax.f32 %v255_v38, 0.0  ;;  %392 = vmatpush3.msra.mxu0 %v264_v37 }
 0x1a8   :  { %393 = vmatprep.subr.mxu0 %v432_v31 }
 0x1a9   :  { %394 = vmatpush3.msra.mxu0 %v263_v39 }
 0x1aa   :  { %396 = vmatmul.mubr.msk.f32.vlgmr.msra.gmra.mxu0 %vm270_vm4, %v42_v40 }
 0x26a   :  { %v340_v42 = vpop.f32.mrf.mxu0 }
 0x26b   :  { %v341_v43 = vadd.f32 %v340_v42, %v268_v41 }
 0x26c   :  { %v397_v44 = vpop.f32.mrf.mxu0 }
 0x26d   :  { %344 = vst [vmem:[%s466_s2] sm:$0x7] %v341_v43 }
 0x26e   :  { %349 = vsyncpa [#allocation3], 1 }

</bundles_post_ra>
